<compile_context>
chip_gen: v5e
topology: v5e:2x2
jax: 0.10.0
libtpu: 0.0.40
codegen_flags: <defaults>
</compile_context>

<pallas_src>
import functools
import math

import jax
import jax.numpy as jnp
from jax import lax
from jax.experimental import pallas as pl
from jax.experimental.pallas import tpu as pltpu


# ----------------------------------------------------------------------------- buffer
def make_sinusoidal_pe(max_len: int, d_model: int, dtype=jnp.float32) -> jnp.ndarray:
    """Deterministic buffer init, identical math to the PyTorch __init__."""
    position = jnp.arange(0, max_len, dtype=jnp.float32)[:, None]              # (L, 1)
    div_term = jnp.exp(
        jnp.arange(0, d_model, 2, dtype=jnp.float32) * -(math.log(10000.0) / d_model)
    )                                                                           # (D/2,)
    pe = jnp.zeros((max_len, d_model), dtype=jnp.float32)
    pe = pe.at[:, 0::2].set(jnp.sin(position * div_term))
    pe = pe.at[:, 1::2].set(jnp.cos(position * div_term))
    return pe.astype(dtype)


# ----------------------------------------------------------------------------- dropout helper
def _keep_mask(seed_i32, flat_ids_i32, p):
    """Stateless per-element keep mask: hash(seed, global element id) >= p*2^32."""
    thr = jnp.uint32(min(int(p * 4294967296.0), 4294967295))
    h = flat_ids_i32.astype(jnp.uint32) ^ seed_i32.astype(jnp.uint32)
    # lowbias32-style integer finalizer (VPU-only ops; interpret-mode friendly).
    h = (h ^ (h >> 16)) * jnp.uint32(0x7FEB352D)
    h = (h ^ (h >> 15)) * jnp.uint32(0x846CA68B)
    h = h ^ (h >> 16)
    return h >= thr


# ----------------------------------------------------------------------------- kernels
def _pe_kernel_3d(seed_ref, x_ref, pe_ref, o_ref, *, S, D, TS, p, train):
    # x_ref, pe_ref, o_ref: (1, TS, D).  Native-dtype add (bf16 stays bf16).
    y = x_ref[...] + pe_ref[...]
    if train and p > 0.0:
        s = pl.program_id(0)           # sequence-tile index (outer grid axis)
        b = pl.program_id(1)           # batch index (inner grid axis)
        r = lax.broadcasted_iota(jnp.int32, (1, TS, D), 1)
        c = lax.broadcasted_iota(jnp.int32, (1, TS, D), 2)
        flat = (b * S + s * TS + r) * D + c          # global element id
        keep = _keep_mask(seed_ref[0], flat, p)
        y = jnp.where(keep, y * (1.0 / (1.0 - p)), jnp.zeros_like(y))
    o_ref[...] = y.astype(o_ref.dtype)


def _pe_kernel_2d(seed_ref, x_ref, pe_ref, o_ref, *, L, TL, p, train):
    # x_ref/o_ref: (B, TL); pe_ref: (1, TL) broadcast over the batch (sublane bcast).
    y = x_ref[...] + pe_ref[...]
    if train and p > 0.0:
        l = pl.program_id(0)
        B = x_ref.shape[0]
        r = lax.broadcasted_iota(jnp.int32, (B, TL), 0)
        c = lax.broadcasted_iota(jnp.int32, (B, TL), 1)
        flat = r * L + l * TL + c                    # global element id
        keep = _keep_mask(seed_ref[0], flat, p)
        y = jnp.where(keep, y * (1.0 / (1.0 - p)), jnp.zeros_like(y))
    o_ref[...] = y.astype(o_ref.dtype)


# ----------------------------------------------------------------------------- wrapper
_TARGET_TILE_BYTES = 2 * 1024 * 1024     # ~2 MiB x-tile: >=85% HBM roofline, fits v7x VMEM
_VMEM_LIMIT = 32 * 1024 * 1024


def positional_encoding(x, pe, *, p=0.1, train=False, seed=0, step=None):
    """x: (B, S, D); pe: (max_len, D). Returns dropout(x + pe) like the module.

    step=None: adds pe[:S] (training / full-sequence path).
    step=k   : adds pe[k] to every position (decode path of the PyTorch forward).
    """
    B, S, D = x.shape

    if step is not None:
        # Decode path: every position gets the same pe row (typically S == 1).
        pe = jnp.broadcast_to(lax.dynamic_slice_in_dim(pe, step, 1, axis=0), (S, D))

    max_len = pe.shape[0]
    assert pe.shape[1] == D, "pe d_model mismatch"
    assert S <= max_len, "sequence longer than positional-encoding buffer"

    if pe.dtype != x.dtype:
        pe = pe.astype(x.dtype)        # compute in x's native dtype (bf16 on v6e/v7x)

    seed_arr = jnp.asarray(seed, dtype=jnp.int32).reshape((1,))
    itemsize = jnp.dtype(x.dtype).itemsize
    compiler_params = dict(vmem_limit_bytes=_VMEM_LIMIT)

    if D % 128 == 0 and S % 8 == 0:
        # ---- native 3D lane-dense path: tile the sequence axis --------------------
        TS = max(8, min(S, (_TARGET_TILE_BYTES // (D * itemsize)) // 8 * 8))
        nS = pl.cdiv(S, TS)
        pe3 = pe.reshape(1, max_len, D)                 # free reshape; no pe[:S] copy
        kernel = functools.partial(_pe_kernel_3d, S=S, D=D, TS=TS,
                                   p=float(p), train=bool(train))
        out = pl.pallas_call(
            kernel,
            out_shape=jax.ShapeDtypeStruct((B, S, D), x.dtype),
            grid_spec=pltpu.PrefetchScalarGridSpec(
                num_scalar_prefetch=1,
                grid=(nS, B),                           # batch inner -> pe tile reused
                in_specs=[
                    pl.BlockSpec((1, TS, D), lambda s, b, seed: (b, s, 0)),
                    pl.BlockSpec((1, TS, D), lambda s, b, seed: (0, s, 0)),
                ],
                out_specs=pl.BlockSpec((1, TS, D), lambda s, b, seed: (b, s, 0)),
            ),
            compiler_params=pltpu.CompilerParams(
                dimension_semantics=("parallel", "parallel"), **compiler_params),
        )(seed_arr, x, pe3)
        return out

    # ---- flattened 2D path (small / non-128-multiple d_model): lane-dense stores --
    L = S * D
    xf = x.reshape(B, L)                                 # free reshape
    pef = pe[:S].reshape(1, L)                           # tiny copy (only for small D)
    if L <= 128:
        TL = L
    else:
        TL = min(L, max(128, (_TARGET_TILE_BYTES // (B * itemsize)) // 128 * 128))
    nL = pl.cdiv(L, TL)
    kernel = functools.partial(_pe_kernel_2d, L=L, TL=TL,
                               p=float(p), train=bool(train))
    out = pl.pallas_call(
        kernel,
        out_shape=jax.ShapeDtypeStruct((B, L), x.dtype),
        grid_spec=pltpu.PrefetchScalarGridSpec(
            num_scalar_prefetch=1,
            grid=(nL,),
            in_specs=[
                pl.BlockSpec((B, TL), lambda l, seed: (0, l)),
                pl.BlockSpec((1, TL), lambda l, seed: (0, l)),
            ],
            out_specs=pl.BlockSpec((B, TL), lambda l, seed: (0, l)),
        ),
        compiler_params=pltpu.CompilerParams(
            dimension_semantics=("parallel",), **compiler_params),
    )(seed_arr, xf, pef)
    return out.reshape(B, S, D)


# ----------------------------------------------------------------------------- demo / checks
if __name__ == "__main__":
    key = jax.random.PRNGKey(0)
    k1, k2 = jax.random.split(key)
    P = 0.1
    scale = 1.0 / (1.0 - P)

    # Case 1: small d_model -> flattened lane-dense path.
    B, S, D, MAX_LEN = 2, 8, 32, 64
    x = jax.random.normal(k1, (B, S, D), dtype=jnp.float32)
    pe = make_sinusoidal_pe(MAX_LEN, D)
    ref = x + pe[None, :S, :]

    out = jax.block_until_ready(positional_encoding(x, pe, p=P, train=False))
    assert out.shape == (B, S, D)
    assert jnp.allclose(out, ref, atol=1e-6), "eval-mode mismatch (2D path)"

    out_tr = jax.block_until_ready(positional_encoding(x, pe, p=P, train=True, seed=1234))
    ok = jnp.isclose(out_tr, 0.0, atol=1e-6) | jnp.isclose(out_tr, ref * scale, atol=1e-5)
    assert bool(jnp.all(ok)), "train-mode values are not {0, scaled(x+pe)} (2D path)"

    # Decode path (step=k): every position gets pe[step].
    out_step = jax.block_until_ready(
        positional_encoding(x[:, :1], pe, p=P, train=False, step=3))
    assert jnp.allclose(out_step, x[:, :1] + pe[3][None, None, :], atol=1e-6), \
        "step-path mismatch"

    # Case 2: d_model multiple of 128 -> native 3D lane-dense path.
    B2, S2, D2 = 2, 16, 128
    x2 = jax.random.normal(k2, (B2, S2, D2), dtype=jnp.float32)
    pe2 = make_sinusoidal_pe(MAX_LEN, D2)
    ref2 = x2 + pe2[None, :S2, :]

    out2 = jax.block_until_ready(positional_encoding(x2, pe2, p=P, train=False))
    assert jnp.allclose(out2, ref2, atol=1e-6), "eval-mode mismatch (3D path)"

    out2_tr = jax.block_until_ready(positional_encoding(x2, pe2, p=P, train=True, seed=7))
    ok2 = jnp.isclose(out2_tr, 0.0, atol=1e-6) | jnp.isclose(out2_tr, ref2 * scale, atol=1e-5)
    assert bool(jnp.all(ok2)), "train-mode values are not {0, scaled(x+pe)} (3D path)"

    print("KERNEL_OK")
</pallas_src>

<mosaic_0001>
module attributes {stable_mosaic.version = 11 : i64} {
  func.func @_pe_kernel_2d(%arg0: i32, %arg1: memref<1xi32, #tpu.memory_space<smem>>, %arg2: memref<2x256xf32, #tpu.memory_space<vmem>>, %arg3: memref<1x256xf32, #tpu.memory_space<vmem>>, %arg4: memref<2x256xf32, #tpu.memory_space<vmem>>) attributes {dimension_semantics = [#tpu.dimension_semantics<parallel>], iteration_bounds = array<i64: 1>, scalar_prefetch = 1 : i64, scratch_operands = 0 : i64, tpu.core_type = #tpu.core_type<tc>, window_params = [{transform_indices = @transform_0, window_bounds = array<i64: 2, 256>}, {transform_indices = @transform_1, window_bounds = array<i64: 1, 256>}, {transform_indices = @transform_2, window_bounds = array<i64: 2, 256>}]} {
    %c0 = arith.constant 0 : index
    %c0_0 = arith.constant 0 : index
    %0 = vector.load %arg2[%c0, %c0_0] : memref<2x256xf32, #tpu.memory_space<vmem>>, vector<2x256xf32>
    %c0_1 = arith.constant 0 : index
    %c0_2 = arith.constant 0 : index
    %1 = vector.load %arg3[%c0_1, %c0_2] : memref<1x256xf32, #tpu.memory_space<vmem>>, vector<1x256xf32>
    %2 = vector.broadcast %1 : vector<1x256xf32> to vector<2x256xf32>
    %3 = arith.addf %0, %2 : vector<2x256xf32>
    %c0_3 = arith.constant 0 : index
    %c0_4 = arith.constant 0 : index
    %4 = vector.load %arg4[%c0_3, %c0_4] : memref<2x256xf32, #tpu.memory_space<vmem>>, vector<2x256xf32>
    tpu.vector_store %arg4[%c0_3, %c0_4], %3 {strides = array<i32>} : memref<2x256xf32, #tpu.memory_space<vmem>>, vector<2x256xf32>,
    return
  }
  func.func @transform_0(%arg0: i32, %arg1: memref<1xi32, #tpu.memory_space<smem>>) -> (i32, i32) {
    %c0_i32 = arith.constant 0 : i32
    %c0_i32_0 = arith.constant 0 : i32
    return %c0_i32, %arg0 : i32, i32
  }
  func.func @transform_1(%arg0: i32, %arg1: memref<1xi32, #tpu.memory_space<smem>>) -> (i32, i32) {
    %c0_i32 = arith.constant 0 : i32
    %c0_i32_0 = arith.constant 0 : i32
    return %c0_i32, %arg0 : i32, i32
  }
  func.func @transform_2(%arg0: i32, %arg1: memref<1xi32, #tpu.memory_space<smem>>) -> (i32, i32) {
    %c0_i32 = arith.constant 0 : i32
    %c0_i32_0 = arith.constant 0 : i32
    return %c0_i32, %arg0 : i32, i32
  }
}

</mosaic_0001>

<bundles_post_ra>
// kernel: tpu_custom_call.1
= control target key start
LH: loop header
LB: loop body
LE: loop exit
PB: predicated region body
PF: predicated region fallthrough
CT: control target
= control target key end

     0   :  { %9 = vsyncpa [#allocation5], 0  ;;  %s141_s0 = inlined_call_operand.<no memory space> [shape: s32[1], index: 0, kind: input, shape index: {}]   ;;  %s142_s1 = inlined_call_operand.hbm [shape: f32[2,256], index: 1, kind: input, shape index: {}]   ;;  %s143_s2 = inlined_call_operand.vmem [shape: f32[1,256], index: 2, kind: input, shape index: {}]   ;;  %s144_s3 = inlined_call_operand.hbm [shape: f32[2,256], index: 3, kind: output, shape index: {}]  }
   0x1   :  { %10 = vsyncpa [#allocation6], 0  ;;  %s16_s14 = sshll.u32 %s142_s1, 4  ;;  %s110_s15 = smov [#allocation4]   ;;  %s17_s14 = int_to_ptr.hbm [resolvable:$true] %s16_s14 }
   0x2   :  { %s18_s16 = sshll.u32 %s110_s15, 4  ;;  %s19_s16 = int_to_ptr.vmem [resolvable:$true] %s18_s16 }
   0x3   :  { %21 = dma.hbm_to_vmem [thread:$0]  %s17_s14, 64, %s19_s16, [#allocation5]  }
   0x4   :  { %106 = dma.done.wait [#allocation5], 64  }
   0x5   :  { %107 = vsyncadd [#allocation5], 4294967232  ;;  %v29_v0 = vld [vmem:[%s143_s2] sm:$0x3]  ;;  %vm34_vm0 = vcmask 1041408   ;;  %s111_s18 = smov [#allocation7]  }
   0x6   :  { %v31_v1 = vperm.slane %v29_v0, 0  ;;  %v32_v2 = vperm.slane %v29_v0, 1  ;;  %v28_v3 = vld [vmem:[#allocation4] sm:$0xf]  ;;  %s44_s19 = sshll.u32 %s111_s18, 4  ;;  %s46_s21 = sshll.u32 %s144_s3, 4  ;;  %s45_s19 = int_to_ptr.vmem [resolvable:$true] %s44_s19  ;;  %s47_s21 = int_to_ptr.hbm [resolvable:$true] %s46_s21 }
   0x8   :  { %v33_v4 = vrot.slane %v32_v2, 6 }
   0xa   :  { %v35_v5 = vsel %vm34_vm0, %v31_v1, %v33_v4 }
   0xb   :  { %v37_v6 = vadd.f32 %v35_v5, %v28_v3 }
   0xd   :  { %38 = vst [vmem:[#allocation7] sm:$0xf] %v37_v6 }
   0xe   :  { %49 = dma.vmem_to_hbm [thread:$0]  %s45_s19, 64, %s47_s21, [#allocation6]  }
   0xf   :  { %108 = dma.done.wait [#allocation6], 64  }
  0x10   :  { %109 = vsyncadd [#allocation6], 4294967232 }
  0x11   :  { %54 = vsyncpa [#allocation5], 1 }
  0x12   :  { %55 = vsyncpa [#allocation6], 1 }

</bundles_post_ra>
